<compile_context>
chip_gen: v7x
topology: tpu7x:2x2x1
jax: 0.10.0
libtpu: 0.0.40
codegen_flags: <defaults>
</compile_context>

<pallas_src>
import jax
import jax.numpy as jnp
from jax.experimental import pallas as pl
from jax.experimental.pallas import tpu as pltpu

_TARGET_BLOCK_BYTES = 2 << 20  # ~2 MiB per block


def _relu_kernel(x_ref, o_ref):
    x = x_ref[...]
    # Zero of the input dtype: keeps bf16 / integer paths exact (no weak-float
    # promotion, no implicit cast on store).
    o_ref[...] = jnp.maximum(x, jnp.zeros((), dtype=x.dtype))


def _choose_layout(n, itemsize, min_rows):
    """Pick (lanes, rows, pad_elems) for viewing n elements as (rows, lanes)."""
    # Prefer the widest lane count that divides n exactly -> no pad/slice
    # round-trip.
    for lanes in (2048, 1024, 512, 256, 128):
        if n % lanes:
            continue
        rows = n // lanes
        if rows % min_rows == 0:
            return lanes, rows, 0  # no pad, tileable along rows
        if rows * lanes * itemsize <= _TARGET_BLOCK_BYTES:
            return lanes, rows, 0  # no pad, single full-height block
    # Fallback: pad only to the minimal tile granule (min_rows x lanes),
    # decoupled from the full block size.
    lanes = 512
    granule = min_rows * lanes
    n_pad = pl.cdiv(n, granule) * granule
    return lanes, n_pad // lanes, n_pad - n


def pallas_relu(x: jax.Array) -> jax.Array:
    """Elementwise ReLU implemented as a Pallas TPU kernel."""
    orig_shape = x.shape
    dtype = x.dtype
    n = x.size
    if n == 0:
        return x

    itemsize = jnp.dtype(dtype).itemsize
    # Packed-sublane granularity: 8 rows for f32, 16 for bf16, 32 for int8.
    min_rows = 8 * max(1, 4 // itemsize)

    lanes, rows, pad = _choose_layout(n, itemsize, min_rows)

    flat = x.reshape(-1)
    if pad:
        flat = jnp.pad(flat, (0, pad))
    x2d = flat.reshape(rows, lanes)

    if rows % min_rows == 0:
        target_rows = max(
            min_rows,
            (_TARGET_BLOCK_BYTES // (lanes * itemsize)) // min_rows * min_rows,
        )
        block_rows = min(target_rows, rows)
        # Prefer a grid of >= 2 blocks so the "parallel" axis can shard across
        # v7x's two TensorCores.
        if pl.cdiv(rows, block_rows) < 2 and rows >= 2 * min_rows:
            block_rows = pl.cdiv(pl.cdiv(rows, 2), min_rows) * min_rows
    else:
        # rows is not a sublane multiple; only legal as a single full-height
        # block (guaranteed small by _choose_layout).
        block_rows = rows

    grid = pl.cdiv(rows, block_rows)

    out2d = pl.pallas_call(
        _relu_kernel,
        out_shape=jax.ShapeDtypeStruct((rows, lanes), dtype),
        grid_spec=pltpu.PrefetchScalarGridSpec(
            num_scalar_prefetch=0,
            grid=(grid,),
            in_specs=[pl.BlockSpec((block_rows, lanes), lambda i: (i, 0))],
            out_specs=pl.BlockSpec((block_rows, lanes), lambda i: (i, 0)),
        ),
        compiler_params=pltpu.CompilerParams(
            dimension_semantics=("parallel",),
        ),
    )(x2d)

    if pad:
        return out2d.reshape(-1)[:n].reshape(orig_shape)
    return out2d.reshape(orig_shape)


if __name__ == "__main__":
    key = jax.random.PRNGKey(0)

    # Shape from the original module: x152 = randn([1, 896, 14, 14]).
    x = jax.random.normal(key, (1, 896, 14, 14), dtype=jnp.float32)
    out = pallas_relu(x)
    jax.block_until_ready(out)
    ref = jnp.maximum(x, 0.0)
    assert out.shape == x.shape and out.dtype == x.dtype
    assert jnp.array_equal(out, ref), "Pallas ReLU mismatch vs reference"

    # Exercise the multi-block (megacore-split, ragged last block) path.
    x2 = jax.random.normal(jax.random.PRNGKey(1), (2, 4, 48, 128), dtype=jnp.float32)
    out2 = pallas_relu(x2)
    jax.block_until_ready(out2)
    assert jnp.array_equal(out2, jnp.maximum(x2, 0.0)), "Pallas ReLU mismatch (multi-block path)"

    # Exercise the ragged (padded) fallback path.
    x3 = jax.random.normal(jax.random.PRNGKey(2), (3, 5, 7, 11), dtype=jnp.float32)
    out3 = pallas_relu(x3)
    jax.block_until_ready(out3)
    assert jnp.array_equal(out3, jnp.maximum(x3, 0.0)), "Pallas ReLU mismatch (padded path)"

    print("KERNEL_OK")
</pallas_src>

<mosaic_0001>
module attributes {stable_mosaic.version = 11 : i64} {
  func.func @_relu_kernel(%arg0: i32, %arg1: memref<343x512xf32, #tpu.memory_space<vmem>>, %arg2: memref<343x512xf32, #tpu.memory_space<vmem>>) attributes {dimension_semantics = [#tpu.dimension_semantics<parallel>], iteration_bounds = array<i64: 1>, scalar_prefetch = 0 : i64, scratch_operands = 0 : i64, tpu.core_type = #tpu.core_type<tc>, window_params = [{transform_indices = @transform_0, window_bounds = array<i64: 343, 512>}, {transform_indices = @transform_1, window_bounds = array<i64: 343, 512>}]} {
    %c0 = arith.constant 0 : index
    %c0_0 = arith.constant 0 : index
    %0 = vector.load %arg1[%c0, %c0_0] : memref<343x512xf32, #tpu.memory_space<vmem>>, vector<343x512xf32>
    %cst = arith.constant 0.000000e+00 : f32
    %1 = vector.broadcast %cst : f32 to vector<343x512xf32>
    %2 = arith.maximumf %0, %1 : vector<343x512xf32>
    %c0_1 = arith.constant 0 : index
    %c0_2 = arith.constant 0 : index
    %3 = vector.load %arg2[%c0_1, %c0_2] : memref<343x512xf32, #tpu.memory_space<vmem>>, vector<343x512xf32>
    tpu.vector_store %arg2[%c0_1, %c0_2], %2 {strides = array<i32>} : memref<343x512xf32, #tpu.memory_space<vmem>>, vector<343x512xf32>,
    return
  }
  func.func @transform_0(%arg0: i32) -> (i32, i32) {
    %c0_i32 = arith.constant 0 : i32
    %c0_i32_0 = arith.constant 0 : i32
    return %arg0, %c0_i32 : i32, i32
  }
  func.func @transform_1(%arg0: i32) -> (i32, i32) {
    %c0_i32 = arith.constant 0 : i32
    %c0_i32_0 = arith.constant 0 : i32
    return %arg0, %c0_i32 : i32, i32
  }
}

</mosaic_0001>

<bundles_post_ra>
// kernel: tpu_custom_call.1
= control target key start
LH: loop header
LB: loop body
LE: loop exit
PB: predicated region body
PF: predicated region fallthrough
CT: control target
= control target key end

     0   :  { %6 = vsyncpa [#allocation3], 0  ;;  %s652_s0 = inlined_call_operand.hbm [shape: f32[343,512], index: 0, kind: input, shape index: {}]   ;;  %s653_s1 = inlined_call_operand.hbm [shape: f32[343,512], index: 1, kind: output, shape index: {}]  }
   0x1   :  { %7 = vsyncpa [#allocation4], 0  ;;  %s608_s6 = smov [#allocation2]   ;;  %s560_s10 = scalar_lea.hbm %s652_s0, 22016 }
   0x2   :  { %s13_s7 = sshll.u32 %s608_s6, 4  ;;  %p561_p0 = scmp.ne.s32.totalorder %s652_s0, %s560_s10  ;;  %s14_s7 = int_to_ptr.vmem [resolvable:$true] %s13_s7 }
   0x3   :  { %p564_p1 = scmp.lt.u32.totalorder %s560_s10, %s652_s0 }
   0x5   :  { %p566_p2 = pnand %p564_p1, %p561_p0 }
   0x7   :  { %569 = shalt.err (!%p566_p2)
}
   0x8   :  { %s570_s15 = scalar_lea.vmem %s14_s7, 22016  ;;  %p575_p4 = scmp.lt.s32.totalorder %s14_s7, %s14_s7 }
   0x9   :  { %p571_p3 = scmp.ne.s32.totalorder %s14_s7, %s570_s15  ;;  %p576_p5 = scmp.lt.s32.totalorder %s570_s15, %s570_s15 }
   0xb   :  { %p577_p6 = por %p576_p5, %p575_p4 }
   0xd   :  { %p578_p7 = pnand %p577_p6, %p571_p3 }
   0xf   :  { %581 = shalt.err (!%p578_p7)
}
  0x10   :  { %s609_s16 = smov 512   ;;  %s610_s17 = smov 32  }
  0x11   :  { %19 = dma.hbm_to_vmem [thread:$0]  %s652_s0, 22016, %s14_s7, [#allocation3], %s609_s16, %s609_s16, %s610_s17  }
  0x12   :  { %604 = dma.done.wait [#allocation3], 22016  }
  0x13   :  { %605 = vsyncadd [#allocation3], 4294945280  ;;  %v23_v0 = vld [vmem:[#allocation2] sm:$0xff]  ;;  %v24_v1 = vld [vmem:[#allocation2 + $0x8] sm:$0xff]  ;;  %s611_s0 = smov [#allocation5]  }
  0x14   :  { %v25_v2 = vld [vmem:[#allocation2 + $0x10] sm:$0xff]  ;;  %v195_v3 = vmax.f32 %v23_v0, 0.0  ;;  %v196_v4 = vmax.f32 %v24_v1, 0.0  ;;  %v26_v6 = vld [vmem:[#allocation2 + $0x18] sm:$0xff]  ;;  %v27_v7 = vld [vmem:[#allocation2 + $0x20] sm:$0xff]  ;;  %s544_s20 = sshll.u32 %s611_s0, 4  ;;  %s545_s20 = int_to_ptr.vmem [resolvable:$true] %s544_s20 }
  0x15   :  { %v197_v5 = vmax.f32 %v25_v2, 0.0  ;;  %v28_v8 = vld [vmem:[#allocation2 + $0x28] sm:$0xff]  ;;  %v198_v9 = vmax.f32 %v26_v6, 0.0  ;;  %v199_v10 = vmax.f32 %v27_v7, 0.0  ;;  %v29_v12 = vld [vmem:[#allocation2 + $0x30] sm:$0xff]  ;;  %v30_v13 = vld [vmem:[#allocation2 + $0x38] sm:$0xff]  ;;  %p587_p9 = scmp.lt.s32.totalorder %s545_s20, %s545_s20 }
  0x16   :  { %v200_v11 = vmax.f32 %v28_v8, 0.0  ;;  %v31_v14 = vld [vmem:[#allocation2 + $0x40] sm:$0xff]  ;;  %367 = vst [vmem:[#allocation5] sm:$0xff] %v195_v3  ;;  %368 = vst [vmem:[#allocation5 + $0x8] sm:$0xff] %v196_v4  ;;  %v201_v15 = vmax.f32 %v29_v12, 0.0  ;;  %v202_v16 = vmax.f32 %v30_v13, 0.0 }
  0x17   :  { %369 = vst [vmem:[#allocation5 + $0x10] sm:$0xff] %v197_v5  ;;  %v203_v17 = vmax.f32 %v31_v14, 0.0  ;;  %v32_v18 = vld [vmem:[#allocation2 + $0x48] sm:$0xff]  ;;  %v33_v19 = vld [vmem:[#allocation2 + $0x50] sm:$0xff]  ;;  %v34_v20 = vld [vmem:[#allocation2 + $0x58] sm:$0xff]  ;;  %s582_s21 = scalar_lea.vmem %s545_s20, 22016 }
  0x18   :  { %370 = vst [vmem:[#allocation5 + $0x18] sm:$0xff] %v198_v9  ;;  %371 = vst [vmem:[#allocation5 + $0x20] sm:$0xff] %v199_v10  ;;  %v204_v21 = vmax.f32 %v32_v18, 0.0  ;;  %v205_v22 = vmax.f32 %v33_v19, 0.0  ;;  %v206_v23 = vmax.f32 %v34_v20, 0.0  ;;  %v35_v24 = vld [vmem:[#allocation2 + $0x60] sm:$0xff]  ;;  %p583_p8 = scmp.ne.s32.totalorder %s545_s20, %s582_s21  ;;  %p588_p10 = scmp.lt.s32.totalorder %s582_s21, %s582_s21 }
  0x19   :  { %372 = vst [vmem:[#allocation5 + $0x28] sm:$0xff] %v200_v11  ;;  %v36_v25 = vld [vmem:[#allocation2 + $0x68] sm:$0xff]  ;;  %v37_v26 = vld [vmem:[#allocation2 + $0x70] sm:$0xff]  ;;  %373 = vst [vmem:[#allocation5 + $0x30] sm:$0xff] %v201_v15  ;;  %v207_v27 = vmax.f32 %v35_v24, 0.0 }
  0x1a   :  { %374 = vst [vmem:[#allocation5 + $0x38] sm:$0xff] %v202_v16  ;;  %375 = vst [vmem:[#allocation5 + $0x40] sm:$0xff] %v203_v17  ;;  %v208_v28 = vmax.f32 %v36_v25, 0.0  ;;  %v209_v29 = vmax.f32 %v37_v26, 0.0  ;;  %v38_v30 = vld [vmem:[#allocation2 + $0x78] sm:$0xff]  ;;  %v39_v31 = vld [vmem:[#allocation2 + $0x80] sm:$0xff]  ;;  %p589_p11 = por %p588_p10, %p587_p9 }
  0x1b   :  { %v40_v32 = vld [vmem:[#allocation2 + $0x88] sm:$0xff]  ;;  %376 = vst [vmem:[#allocation5 + $0x48] sm:$0xff] %v204_v21  ;;  %377 = vst [vmem:[#allocation5 + $0x50] sm:$0xff] %v205_v22  ;;  %v210_v33 = vmax.f32 %v38_v30, 0.0  ;;  %v211_v34 = vmax.f32 %v39_v31, 0.0  ;;  %v41_v36 = vld [vmem:[#allocation2 + $0x90] sm:$0xff] }
  0x1c   :  { %378 = vst [vmem:[#allocation5 + $0x58] sm:$0xff] %v206_v23  ;;  %v212_v35 = vmax.f32 %v40_v32, 0.0  ;;  %v42_v37 = vld [vmem:[#allocation2 + $0x98] sm:$0xff]  ;;  %v43_v38 = vld [vmem:[#allocation2 + $0xa0] sm:$0xff]  ;;  %379 = vst [vmem:[#allocation5 + $0x60] sm:$0xff] %v207_v27  ;;  %v213_v39 = vmax.f32 %v41_v36, 0.0  ;;  %p590_p12 = pnand %p589_p11, %p583_p8 }
  0x1d   :  { %380 = vst [vmem:[#allocation5 + $0x68] sm:$0xff] %v208_v28  ;;  %381 = vst [vmem:[#allocation5 + $0x70] sm:$0xff] %v209_v29  ;;  %v214_v40 = vmax.f32 %v42_v37, 0.0  ;;  %v215_v41 = vmax.f32 %v43_v38, 0.0  ;;  %v44_v42 = vld [vmem:[#allocation2 + $0xa8] sm:$0xff]  ;;  %v45_v43 = vld [vmem:[#allocation2 + $0xb0] sm:$0xff] }
  0x1e   :  { %v46_v44 = vld [vmem:[#allocation2 + $0xb8] sm:$0xff]  ;;  %382 = vst [vmem:[#allocation5 + $0x78] sm:$0xff] %v210_v33  ;;  %383 = vst [vmem:[#allocation5 + $0x80] sm:$0xff] %v211_v34  ;;  %v216_v45 = vmax.f32 %v44_v42, 0.0  ;;  %v217_v46 = vmax.f32 %v45_v43, 0.0  ;;  %v47_v48 = vld [vmem:[#allocation2 + $0xc0] sm:$0xff] }
  0x1f   :  { %384 = vst [vmem:[#allocation5 + $0x88] sm:$0xff] %v212_v35  ;;  %v218_v47 = vmax.f32 %v46_v44, 0.0  ;;  %v48_v49 = vld [vmem:[#allocation2 + $0xc8] sm:$0xff]  ;;  %v49_v50 = vld [vmem:[#allocation2 + $0xd0] sm:$0xff]  ;;  %385 = vst [vmem:[#allocation5 + $0x90] sm:$0xff] %v213_v39  ;;  %v219_v51 = vmax.f32 %v47_v48, 0.0 }
  0x20   :  { %386 = vst [vmem:[#allocation5 + $0x98] sm:$0xff] %v214_v40  ;;  %387 = vst [vmem:[#allocation5 + $0xa0] sm:$0xff] %v215_v41  ;;  %v220_v52 = vmax.f32 %v48_v49, 0.0  ;;  %v221_v53 = vmax.f32 %v49_v50, 0.0  ;;  %v50_v54 = vld [vmem:[#allocation2 + $0xd8] sm:$0xff]  ;;  %v51_v55 = vld [vmem:[#allocation2 + $0xe0] sm:$0xff] }
  0x21   :  { %v52_v56 = vld [vmem:[#allocation2 + $0xe8] sm:$0xff]  ;;  %388 = vst [vmem:[#allocation5 + $0xa8] sm:$0xff] %v216_v45  ;;  %389 = vst [vmem:[#allocation5 + $0xb0] sm:$0xff] %v217_v46  ;;  %v222_v57 = vmax.f32 %v50_v54, 0.0  ;;  %v223_v58 = vmax.f32 %v51_v55, 0.0  ;;  %v53_v60 = vld [vmem:[#allocation2 + $0xf0] sm:$0xff] }
  0x22   :  { %390 = vst [vmem:[#allocation5 + $0xb8] sm:$0xff] %v218_v47  ;;  %v224_v59 = vmax.f32 %v52_v56, 0.0  ;;  %v54_v61 = vld [vmem:[#allocation2 + $0xf8] sm:$0xff]  ;;  %v55_v62 = vld [vmem:[#allocation2 + $0x100] sm:$0xff]  ;;  %391 = vst [vmem:[#allocation5 + $0xc0] sm:$0xff] %v219_v51  ;;  %v225_v63 = vmax.f32 %v53_v60, 0.0 }
  0x23   :  { %392 = vst [vmem:[#allocation5 + $0xc8] sm:$0xff] %v220_v52  ;;  %393 = vst [vmem:[#allocation5 + $0xd0] sm:$0xff] %v221_v53  ;;  %v226_v0 = vmax.f32 %v54_v61, 0.0  ;;  %v227_v1 = vmax.f32 %v55_v62, 0.0  ;;  %v56_v2 = vld [vmem:[#allocation2 + $0x108] sm:$0xff]  ;;  %v57_v3 = vld [vmem:[#allocation2 + $0x110] sm:$0xff] }
  0x24   :  { %v58_v4 = vld [vmem:[#allocation2 + $0x118] sm:$0xff]  ;;  %394 = vst [vmem:[#allocation5 + $0xd8] sm:$0xff] %v222_v57  ;;  %395 = vst [vmem:[#allocation5 + $0xe0] sm:$0xff] %v223_v58  ;;  %v228_v5 = vmax.f32 %v56_v2, 0.0  ;;  %v229_v6 = vmax.f32 %v57_v3, 0.0  ;;  %v59_v8 = vld [vmem:[#allocation2 + $0x120] sm:$0xff] }
  0x25   :  { %396 = vst [vmem:[#allocation5 + $0xe8] sm:$0xff] %v224_v59  ;;  %v230_v7 = vmax.f32 %v58_v4, 0.0  ;;  %v60_v9 = vld [vmem:[#allocation2 + $0x128] sm:$0xff]  ;;  %v61_v10 = vld [vmem:[#allocation2 + $0x130] sm:$0xff]  ;;  %397 = vst [vmem:[#allocation5 + $0xf0] sm:$0xff] %v225_v63  ;;  %v231_v11 = vmax.f32 %v59_v8, 0.0 }
  0x26   :  { %398 = vst [vmem:[#allocation5 + $0xf8] sm:$0xff] %v226_v0  ;;  %399 = vst [vmem:[#allocation5 + $0x100] sm:$0xff] %v227_v1  ;;  %v232_v12 = vmax.f32 %v60_v9, 0.0  ;;  %v233_v13 = vmax.f32 %v61_v10, 0.0  ;;  %v62_v14 = vld [vmem:[#allocation2 + $0x138] sm:$0xff]  ;;  %v63_v15 = vld [vmem:[#allocation2 + $0x140] sm:$0xff] }
  0x27   :  { %v64_v16 = vld [vmem:[#allocation2 + $0x148] sm:$0xff]  ;;  %400 = vst [vmem:[#allocation5 + $0x108] sm:$0xff] %v228_v5  ;;  %401 = vst [vmem:[#allocation5 + $0x110] sm:$0xff] %v229_v6  ;;  %v234_v17 = vmax.f32 %v62_v14, 0.0  ;;  %v235_v18 = vmax.f32 %v63_v15, 0.0  ;;  %v65_v20 = vld [vmem:[#allocation2 + $0x150] sm:$0xff] }
  0x28   :  { %402 = vst [vmem:[#allocation5 + $0x118] sm:$0xff] %v230_v7  ;;  %v236_v19 = vmax.f32 %v64_v16, 0.0  ;;  %v66_v21 = vld [vmem:[#allocation2 + $0x158] sm:$0xff]  ;;  %v67_v22 = vld [vmem:[#allocation2 + $0x160] sm:$0xff]  ;;  %403 = vst [vmem:[#allocation5 + $0x120] sm:$0xff] %v231_v11  ;;  %v237_v23 = vmax.f32 %v65_v20, 0.0 }
  0x29   :  { %404 = vst [vmem:[#allocation5 + $0x128] sm:$0xff] %v232_v12  ;;  %405 = vst [vmem:[#allocation5 + $0x130] sm:$0xff] %v233_v13  ;;  %v238_v24 = vmax.f32 %v66_v21, 0.0  ;;  %v239_v25 = vmax.f32 %v67_v22, 0.0  ;;  %v68_v26 = vld [vmem:[#allocation2 + $0x168] sm:$0xff]  ;;  %v69_v27 = vld [vmem:[#allocation2 + $0x170] sm:$0xff] }
  0x2a   :  { %v70_v28 = vld [vmem:[#allocation2 + $0x178] sm:$0xff]  ;;  %406 = vst [vmem:[#allocation5 + $0x138] sm:$0xff] %v234_v17  ;;  %407 = vst [vmem:[#allocation5 + $0x140] sm:$0xff] %v235_v18  ;;  %v240_v29 = vmax.f32 %v68_v26, 0.0  ;;  %v241_v30 = vmax.f32 %v69_v27, 0.0  ;;  %v71_v32 = vld [vmem:[#allocation2 + $0x180] sm:$0xff] }
  0x2b   :  { %408 = vst [vmem:[#allocation5 + $0x148] sm:$0xff] %v236_v19  ;;  %v242_v31 = vmax.f32 %v70_v28, 0.0  ;;  %v72_v33 = vld [vmem:[#allocation2 + $0x188] sm:$0xff]  ;;  %v73_v34 = vld [vmem:[#allocation2 + $0x190] sm:$0xff]  ;;  %409 = vst [vmem:[#allocation5 + $0x150] sm:$0xff] %v237_v23  ;;  %v243_v35 = vmax.f32 %v71_v32, 0.0 }
  0x2c   :  { %410 = vst [vmem:[#allocation5 + $0x158] sm:$0xff] %v238_v24  ;;  %411 = vst [vmem:[#allocation5 + $0x160] sm:$0xff] %v239_v25  ;;  %v244_v36 = vmax.f32 %v72_v33, 0.0  ;;  %v245_v37 = vmax.f32 %v73_v34, 0.0  ;;  %v74_v38 = vld [vmem:[#allocation2 + $0x198] sm:$0xff]  ;;  %v75_v39 = vld [vmem:[#allocation2 + $0x1a0] sm:$0xff] }
  0x2d   :  { %v76_v40 = vld [vmem:[#allocation2 + $0x1a8] sm:$0xff]  ;;  %412 = vst [vmem:[#allocation5 + $0x168] sm:$0xff] %v240_v29  ;;  %413 = vst [vmem:[#allocation5 + $0x170] sm:$0xff] %v241_v30  ;;  %v246_v41 = vmax.f32 %v74_v38, 0.0  ;;  %v247_v42 = vmax.f32 %v75_v39, 0.0  ;;  %v77_v44 = vld [vmem:[#allocation2 + $0x1b0] sm:$0xff] }
  0x2e   :  { %414 = vst [vmem:[#allocation5 + $0x178] sm:$0xff] %v242_v31  ;;  %v248_v43 = vmax.f32 %v76_v40, 0.0  ;;  %v78_v45 = vld [vmem:[#allocation2 + $0x1b8] sm:$0xff]  ;;  %v79_v46 = vld [vmem:[#allocation2 + $0x1c0] sm:$0xff]  ;;  %415 = vst [vmem:[#allocation5 + $0x180] sm:$0xff] %v243_v35  ;;  %v249_v47 = vmax.f32 %v77_v44, 0.0 }
  0x2f   :  { %416 = vst [vmem:[#allocation5 + $0x188] sm:$0xff] %v244_v36  ;;  %417 = vst [vmem:[#allocation5 + $0x190] sm:$0xff] %v245_v37  ;;  %v250_v48 = vmax.f32 %v78_v45, 0.0  ;;  %v251_v49 = vmax.f32 %v79_v46, 0.0  ;;  %v80_v50 = vld [vmem:[#allocation2 + $0x1c8] sm:$0xff]  ;;  %v81_v51 = vld [vmem:[#allocation2 + $0x1d0] sm:$0xff] }
  0x30   :  { %v82_v52 = vld [vmem:[#allocation2 + $0x1d8] sm:$0xff]  ;;  %418 = vst [vmem:[#allocation5 + $0x198] sm:$0xff] %v246_v41  ;;  %419 = vst [vmem:[#allocation5 + $0x1a0] sm:$0xff] %v247_v42  ;;  %v252_v53 = vmax.f32 %v80_v50, 0.0  ;;  %v253_v54 = vmax.f32 %v81_v51, 0.0  ;;  %v83_v56 = vld [vmem:[#allocation2 + $0x1e0] sm:$0xff] }
  0x31   :  { %420 = vst [vmem:[#allocation5 + $0x1a8] sm:$0xff] %v248_v43  ;;  %v254_v55 = vmax.f32 %v82_v52, 0.0  ;;  %v84_v57 = vld [vmem:[#allocation2 + $0x1e8] sm:$0xff]  ;;  %v85_v58 = vld [vmem:[#allocation2 + $0x1f0] sm:$0xff]  ;;  %421 = vst [vmem:[#allocation5 + $0x1b0] sm:$0xff] %v249_v47  ;;  %v255_v59 = vmax.f32 %v83_v56, 0.0 }
  0x32   :  { %422 = vst [vmem:[#allocation5 + $0x1b8] sm:$0xff] %v250_v48  ;;  %423 = vst [vmem:[#allocation5 + $0x1c0] sm:$0xff] %v251_v49  ;;  %v256_v60 = vmax.f32 %v84_v57, 0.0  ;;  %v257_v61 = vmax.f32 %v85_v58, 0.0  ;;  %v86_v62 = vld [vmem:[#allocation2 + $0x1f8] sm:$0xff]  ;;  %v87_v63 = vld [vmem:[#allocation2 + $0x200] sm:$0xff] }
  0x33   :  { %v88_v0 = vld [vmem:[#allocation2 + $0x208] sm:$0xff]  ;;  %424 = vst [vmem:[#allocation5 + $0x1c8] sm:$0xff] %v252_v53  ;;  %425 = vst [vmem:[#allocation5 + $0x1d0] sm:$0xff] %v253_v54  ;;  %v258_v1 = vmax.f32 %v86_v62, 0.0  ;;  %v259_v2 = vmax.f32 %v87_v63, 0.0  ;;  %v89_v4 = vld [vmem:[#allocation2 + $0x210] sm:$0xff] }
  0x34   :  { %426 = vst [vmem:[#allocation5 + $0x1d8] sm:$0xff] %v254_v55  ;;  %v260_v3 = vmax.f32 %v88_v0, 0.0  ;;  %v90_v5 = vld [vmem:[#allocation2 + $0x218] sm:$0xff]  ;;  %v91_v6 = vld [vmem:[#allocation2 + $0x220] sm:$0xff]  ;;  %427 = vst [vmem:[#allocation5 + $0x1e0] sm:$0xff] %v255_v59  ;;  %v261_v7 = vmax.f32 %v89_v4, 0.0 }
  0x35   :  { %428 = vst [vmem:[#allocation5 + $0x1e8] sm:$0xff] %v256_v60  ;;  %429 = vst [vmem:[#allocation5 + $0x1f0] sm:$0xff] %v257_v61  ;;  %v262_v8 = vmax.f32 %v90_v5, 0.0  ;;  %v263_v9 = vmax.f32 %v91_v6, 0.0  ;;  %v92_v10 = vld [vmem:[#allocation2 + $0x228] sm:$0xff]  ;;  %v93_v11 = vld [vmem:[#allocation2 + $0x230] sm:$0xff] }
  0x36   :  { %v94_v12 = vld [vmem:[#allocation2 + $0x238] sm:$0xff]  ;;  %430 = vst [vmem:[#allocation5 + $0x1f8] sm:$0xff] %v258_v1  ;;  %431 = vst [vmem:[#allocation5 + $0x200] sm:$0xff] %v259_v2  ;;  %v264_v13 = vmax.f32 %v92_v10, 0.0  ;;  %v265_v14 = vmax.f32 %v93_v11, 0.0  ;;  %v95_v16 = vld [vmem:[#allocation2 + $0x240] sm:$0xff] }
  0x37   :  { %432 = vst [vmem:[#allocation5 + $0x208] sm:$0xff] %v260_v3  ;;  %v266_v15 = vmax.f32 %v94_v12, 0.0  ;;  %v96_v17 = vld [vmem:[#allocation2 + $0x248] sm:$0xff]  ;;  %v97_v18 = vld [vmem:[#allocation2 + $0x250] sm:$0xff]  ;;  %433 = vst [vmem:[#allocation5 + $0x210] sm:$0xff] %v261_v7  ;;  %v267_v19 = vmax.f32 %v95_v16, 0.0 }
  0x38   :  { %434 = vst [vmem:[#allocation5 + $0x218] sm:$0xff] %v262_v8  ;;  %435 = vst [vmem:[#allocation5 + $0x220] sm:$0xff] %v263_v9  ;;  %v268_v20 = vmax.f32 %v96_v17, 0.0  ;;  %v269_v21 = vmax.f32 %v97_v18, 0.0  ;;  %v98_v22 = vld [vmem:[#allocation2 + $0x258] sm:$0xff]  ;;  %v99_v23 = vld [vmem:[#allocation2 + $0x260] sm:$0xff] }
  0x39   :  { %v100_v24 = vld [vmem:[#allocation2 + $0x268] sm:$0xff]  ;;  %436 = vst [vmem:[#allocation5 + $0x228] sm:$0xff] %v264_v13  ;;  %437 = vst [vmem:[#allocation5 + $0x230] sm:$0xff] %v265_v14  ;;  %v270_v25 = vmax.f32 %v98_v22, 0.0  ;;  %v271_v26 = vmax.f32 %v99_v23, 0.0  ;;  %v101_v28 = vld [vmem:[#allocation2 + $0x270] sm:$0xff] }
  0x3a   :  { %438 = vst [vmem:[#allocation5 + $0x238] sm:$0xff] %v266_v15  ;;  %v272_v27 = vmax.f32 %v100_v24, 0.0  ;;  %v102_v29 = vld [vmem:[#allocation2 + $0x278] sm:$0xff]  ;;  %v103_v30 = vld [vmem:[#allocation2 + $0x280] sm:$0xff]  ;;  %439 = vst [vmem:[#allocation5 + $0x240] sm:$0xff] %v267_v19  ;;  %v273_v31 = vmax.f32 %v101_v28, 0.0 }
  0x3b   :  { %440 = vst [vmem:[#allocation5 + $0x248] sm:$0xff] %v268_v20  ;;  %441 = vst [vmem:[#allocation5 + $0x250] sm:$0xff] %v269_v21  ;;  %v274_v32 = vmax.f32 %v102_v29, 0.0  ;;  %v275_v33 = vmax.f32 %v103_v30, 0.0  ;;  %v104_v34 = vld [vmem:[#allocation2 + $0x288] sm:$0xff]  ;;  %v105_v35 = vld [vmem:[#allocation2 + $0x290] sm:$0xff] }
  0x3c   :  { %v106_v36 = vld [vmem:[#allocation2 + $0x298] sm:$0xff]  ;;  %442 = vst [vmem:[#allocation5 + $0x258] sm:$0xff] %v270_v25  ;;  %443 = vst [vmem:[#allocation5 + $0x260] sm:$0xff] %v271_v26  ;;  %v276_v37 = vmax.f32 %v104_v34, 0.0  ;;  %v277_v38 = vmax.f32 %v105_v35, 0.0  ;;  %v107_v40 = vld [vmem:[#allocation2 + $0x2a0] sm:$0xff] }
  0x3d   :  { %444 = vst [vmem:[#allocation5 + $0x268] sm:$0xff] %v272_v27  ;;  %v278_v39 = vmax.f32 %v106_v36, 0.0  ;;  %v108_v41 = vld [vmem:[#allocation2 + $0x2a8] sm:$0xff]  ;;  %v109_v42 = vld [vmem:[#allocation2 + $0x2b0] sm:$0xff]  ;;  %445 = vst [vmem:[#allocation5 + $0x270] sm:$0xff] %v273_v31  ;;  %v279_v43 = vmax.f32 %v107_v40, 0.0 }
  0x3e   :  { %446 = vst [vmem:[#allocation5 + $0x278] sm:$0xff] %v274_v32  ;;  %447 = vst [vmem:[#allocation5 + $0x280] sm:$0xff] %v275_v33  ;;  %v280_v44 = vmax.f32 %v108_v41, 0.0  ;;  %v281_v45 = vmax.f32 %v109_v42, 0.0  ;;  %v110_v46 = vld [vmem:[#allocation2 + $0x2b8] sm:$0xff]  ;;  %v111_v47 = vld [vmem:[#allocation2 + $0x2c0] sm:$0xff] }
  0x3f   :  { %v112_v48 = vld [vmem:[#allocation2 + $0x2c8] sm:$0xff]  ;;  %448 = vst [vmem:[#allocation5 + $0x288] sm:$0xff] %v276_v37  ;;  %449 = vst [vmem:[#allocation5 + $0x290] sm:$0xff] %v277_v38  ;;  %v282_v49 = vmax.f32 %v110_v46, 0.0  ;;  %v283_v50 = vmax.f32 %v111_v47, 0.0  ;;  %v113_v52 = vld [vmem:[#allocation2 + $0x2d0] sm:$0xff] }
  0x40   :  { %450 = vst [vmem:[#allocation5 + $0x298] sm:$0xff] %v278_v39  ;;  %v284_v51 = vmax.f32 %v112_v48, 0.0  ;;  %v114_v53 = vld [vmem:[#allocation2 + $0x2d8] sm:$0xff]  ;;  %v115_v54 = vld [vmem:[#allocation2 + $0x2e0] sm:$0xff]  ;;  %451 = vst [vmem:[#allocation5 + $0x2a0] sm:$0xff] %v279_v43  ;;  %v285_v55 = vmax.f32 %v113_v52, 0.0 }
  0x41   :  { %452 = vst [vmem:[#allocation5 + $0x2a8] sm:$0xff] %v280_v44  ;;  %453 = vst [vmem:[#allocation5 + $0x2b0] sm:$0xff] %v281_v45  ;;  %v286_v56 = vmax.f32 %v114_v53, 0.0  ;;  %v287_v57 = vmax.f32 %v115_v54, 0.0  ;;  %v116_v58 = vld [vmem:[#allocation2 + $0x2e8] sm:$0xff]  ;;  %v117_v59 = vld [vmem:[#allocation2 + $0x2f0] sm:$0xff] }
  0x42   :  { %v118_v60 = vld [vmem:[#allocation2 + $0x2f8] sm:$0xff]  ;;  %454 = vst [vmem:[#allocation5 + $0x2b8] sm:$0xff] %v282_v49  ;;  %455 = vst [vmem:[#allocation5 + $0x2c0] sm:$0xff] %v283_v50  ;;  %v288_v61 = vmax.f32 %v116_v58, 0.0  ;;  %v289_v62 = vmax.f32 %v117_v59, 0.0  ;;  %v119_v0 = vld [vmem:[#allocation2 + $0x300] sm:$0xff] }
  0x43   :  { %456 = vst [vmem:[#allocation5 + $0x2c8] sm:$0xff] %v284_v51  ;;  %v290_v63 = vmax.f32 %v118_v60, 0.0  ;;  %v120_v1 = vld [vmem:[#allocation2 + $0x308] sm:$0xff]  ;;  %v121_v2 = vld [vmem:[#allocation2 + $0x310] sm:$0xff]  ;;  %457 = vst [vmem:[#allocation5 + $0x2d0] sm:$0xff] %v285_v55  ;;  %v291_v3 = vmax.f32 %v119_v0, 0.0 }
  0x44   :  { %458 = vst [vmem:[#allocation5 + $0x2d8] sm:$0xff] %v286_v56  ;;  %459 = vst [vmem:[#allocation5 + $0x2e0] sm:$0xff] %v287_v57  ;;  %v292_v4 = vmax.f32 %v120_v1, 0.0  ;;  %v293_v5 = vmax.f32 %v121_v2, 0.0  ;;  %v122_v6 = vld [vmem:[#allocation2 + $0x318] sm:$0xff]  ;;  %v123_v7 = vld [vmem:[#allocation2 + $0x320] sm:$0xff] }
  0x45   :  { %v124_v8 = vld [vmem:[#allocation2 + $0x328] sm:$0xff]  ;;  %460 = vst [vmem:[#allocation5 + $0x2e8] sm:$0xff] %v288_v61  ;;  %461 = vst [vmem:[#allocation5 + $0x2f0] sm:$0xff] %v289_v62  ;;  %v294_v9 = vmax.f32 %v122_v6, 0.0  ;;  %v295_v10 = vmax.f32 %v123_v7, 0.0  ;;  %v125_v12 = vld [vmem:[#allocation2 + $0x330] sm:$0xff] }
  0x46   :  { %462 = vst [vmem:[#allocation5 + $0x2f8] sm:$0xff] %v290_v63  ;;  %v296_v11 = vmax.f32 %v124_v8, 0.0  ;;  %v126_v13 = vld [vmem:[#allocation2 + $0x338] sm:$0xff]  ;;  %v127_v14 = vld [vmem:[#allocation2 + $0x340] sm:$0xff]  ;;  %463 = vst [vmem:[#allocation5 + $0x300] sm:$0xff] %v291_v3  ;;  %v297_v15 = vmax.f32 %v125_v12, 0.0 }
  0x47   :  { %464 = vst [vmem:[#allocation5 + $0x308] sm:$0xff] %v292_v4  ;;  %465 = vst [vmem:[#allocation5 + $0x310] sm:$0xff] %v293_v5  ;;  %v298_v16 = vmax.f32 %v126_v13, 0.0  ;;  %v299_v17 = vmax.f32 %v127_v14, 0.0  ;;  %v128_v18 = vld [vmem:[#allocation2 + $0x348] sm:$0xff]  ;;  %v129_v19 = vld [vmem:[#allocation2 + $0x350] sm:$0xff] }
  0x48   :  { %v130_v20 = vld [vmem:[#allocation2 + $0x358] sm:$0xff]  ;;  %466 = vst [vmem:[#allocation5 + $0x318] sm:$0xff] %v294_v9  ;;  %467 = vst [vmem:[#allocation5 + $0x320] sm:$0xff] %v295_v10  ;;  %v300_v21 = vmax.f32 %v128_v18, 0.0  ;;  %v301_v22 = vmax.f32 %v129_v19, 0.0  ;;  %v131_v24 = vld [vmem:[#allocation2 + $0x360] sm:$0xff] }
  0x49   :  { %468 = vst [vmem:[#allocation5 + $0x328] sm:$0xff] %v296_v11  ;;  %v302_v23 = vmax.f32 %v130_v20, 0.0  ;;  %v132_v25 = vld [vmem:[#allocation2 + $0x368] sm:$0xff]  ;;  %v133_v26 = vld [vmem:[#allocation2 + $0x370] sm:$0xff]  ;;  %469 = vst [vmem:[#allocation5 + $0x330] sm:$0xff] %v297_v15  ;;  %v303_v27 = vmax.f32 %v131_v24, 0.0 }
  0x4a   :  { %470 = vst [vmem:[#allocation5 + $0x338] sm:$0xff] %v298_v16  ;;  %471 = vst [vmem:[#allocation5 + $0x340] sm:$0xff] %v299_v17  ;;  %v304_v28 = vmax.f32 %v132_v25, 0.0  ;;  %v305_v29 = vmax.f32 %v133_v26, 0.0  ;;  %v134_v30 = vld [vmem:[#allocation2 + $0x378] sm:$0xff]  ;;  %v135_v31 = vld [vmem:[#allocation2 + $0x380] sm:$0xff] }
  0x4b   :  { %v136_v32 = vld [vmem:[#allocation2 + $0x388] sm:$0xff]  ;;  %472 = vst [vmem:[#allocation5 + $0x348] sm:$0xff] %v300_v21  ;;  %473 = vst [vmem:[#allocation5 + $0x350] sm:$0xff] %v301_v22  ;;  %v306_v33 = vmax.f32 %v134_v30, 0.0  ;;  %v307_v34 = vmax.f32 %v135_v31, 0.0  ;;  %v137_v36 = vld [vmem:[#allocation2 + $0x390] sm:$0xff] }
  0x4c   :  { %474 = vst [vmem:[#allocation5 + $0x358] sm:$0xff] %v302_v23  ;;  %v308_v35 = vmax.f32 %v136_v32, 0.0  ;;  %v138_v37 = vld [vmem:[#allocation2 + $0x398] sm:$0xff]  ;;  %v139_v38 = vld [vmem:[#allocation2 + $0x3a0] sm:$0xff]  ;;  %475 = vst [vmem:[#allocation5 + $0x360] sm:$0xff] %v303_v27  ;;  %v309_v39 = vmax.f32 %v137_v36, 0.0 }
  0x4d   :  { %476 = vst [vmem:[#allocation5 + $0x368] sm:$0xff] %v304_v28  ;;  %477 = vst [vmem:[#allocation5 + $0x370] sm:$0xff] %v305_v29  ;;  %v310_v40 = vmax.f32 %v138_v37, 0.0  ;;  %v311_v41 = vmax.f32 %v139_v38, 0.0  ;;  %v140_v42 = vld [vmem:[#allocation2 + $0x3a8] sm:$0xff]  ;;  %v141_v43 = vld [vmem:[#allocation2 + $0x3b0] sm:$0xff] }
  0x4e   :  { %v142_v44 = vld [vmem:[#allocation2 + $0x3b8] sm:$0xff]  ;;  %478 = vst [vmem:[#allocation5 + $0x378] sm:$0xff] %v306_v33  ;;  %479 = vst [vmem:[#allocation5 + $0x380] sm:$0xff] %v307_v34  ;;  %v312_v45 = vmax.f32 %v140_v42, 0.0  ;;  %v313_v46 = vmax.f32 %v141_v43, 0.0  ;;  %v143_v48 = vld [vmem:[#allocation2 + $0x3c0] sm:$0xff] }
  0x4f   :  { %480 = vst [vmem:[#allocation5 + $0x388] sm:$0xff] %v308_v35  ;;  %v314_v47 = vmax.f32 %v142_v44, 0.0  ;;  %v144_v49 = vld [vmem:[#allocation2 + $0x3c8] sm:$0xff]  ;;  %v145_v50 = vld [vmem:[#allocation2 + $0x3d0] sm:$0xff]  ;;  %481 = vst [vmem:[#allocation5 + $0x390] sm:$0xff] %v309_v39  ;;  %v315_v51 = vmax.f32 %v143_v48, 0.0 }
  0x50   :  { %482 = vst [vmem:[#allocation5 + $0x398] sm:$0xff] %v310_v40  ;;  %483 = vst [vmem:[#allocation5 + $0x3a0] sm:$0xff] %v311_v41  ;;  %v316_v52 = vmax.f32 %v144_v49, 0.0  ;;  %v317_v53 = vmax.f32 %v145_v50, 0.0  ;;  %v146_v54 = vld [vmem:[#allocation2 + $0x3d8] sm:$0xff]  ;;  %v147_v55 = vld [vmem:[#allocation2 + $0x3e0] sm:$0xff] }
  0x51   :  { %v148_v56 = vld [vmem:[#allocation2 + $0x3e8] sm:$0xff]  ;;  %484 = vst [vmem:[#allocation5 + $0x3a8] sm:$0xff] %v312_v45  ;;  %485 = vst [vmem:[#allocation5 + $0x3b0] sm:$0xff] %v313_v46  ;;  %v318_v57 = vmax.f32 %v146_v54, 0.0  ;;  %v319_v58 = vmax.f32 %v147_v55, 0.0  ;;  %v149_v60 = vld [vmem:[#allocation2 + $0x3f0] sm:$0xff] }
  0x52   :  { %486 = vst [vmem:[#allocation5 + $0x3b8] sm:$0xff] %v314_v47  ;;  %v320_v59 = vmax.f32 %v148_v56, 0.0  ;;  %v150_v61 = vld [vmem:[#allocation2 + $0x3f8] sm:$0xff]  ;;  %v151_v62 = vld [vmem:[#allocation2 + $0x400] sm:$0xff]  ;;  %487 = vst [vmem:[#allocation5 + $0x3c0] sm:$0xff] %v315_v51  ;;  %v321_v63 = vmax.f32 %v149_v60, 0.0 }
  0x53   :  { %488 = vst [vmem:[#allocation5 + $0x3c8] sm:$0xff] %v316_v52  ;;  %489 = vst [vmem:[#allocation5 + $0x3d0] sm:$0xff] %v317_v53  ;;  %v322_v0 = vmax.f32 %v150_v61, 0.0  ;;  %v323_v1 = vmax.f32 %v151_v62, 0.0  ;;  %v152_v2 = vld [vmem:[#allocation2 + $0x408] sm:$0xff]  ;;  %v153_v3 = vld [vmem:[#allocation2 + $0x410] sm:$0xff] }
  0x54   :  { %v154_v4 = vld [vmem:[#allocation2 + $0x418] sm:$0xff]  ;;  %490 = vst [vmem:[#allocation5 + $0x3d8] sm:$0xff] %v318_v57  ;;  %491 = vst [vmem:[#allocation5 + $0x3e0] sm:$0xff] %v319_v58  ;;  %v324_v5 = vmax.f32 %v152_v2, 0.0  ;;  %v325_v6 = vmax.f32 %v153_v3, 0.0  ;;  %v155_v8 = vld [vmem:[#allocation2 + $0x420] sm:$0xff] }
  0x55   :  { %492 = vst [vmem:[#allocation5 + $0x3e8] sm:$0xff] %v320_v59  ;;  %v326_v7 = vmax.f32 %v154_v4, 0.0  ;;  %v156_v9 = vld [vmem:[#allocation2 + $0x428] sm:$0xff]  ;;  %v157_v10 = vld [vmem:[#allocation2 + $0x430] sm:$0xff]  ;;  %493 = vst [vmem:[#allocation5 + $0x3f0] sm:$0xff] %v321_v63  ;;  %v327_v11 = vmax.f32 %v155_v8, 0.0 }
  0x56   :  { %494 = vst [vmem:[#allocation5 + $0x3f8] sm:$0xff] %v322_v0  ;;  %495 = vst [vmem:[#allocation5 + $0x400] sm:$0xff] %v323_v1  ;;  %v328_v12 = vmax.f32 %v156_v9, 0.0  ;;  %v329_v13 = vmax.f32 %v157_v10, 0.0  ;;  %v158_v14 = vld [vmem:[#allocation2 + $0x438] sm:$0xff]  ;;  %v159_v15 = vld [vmem:[#allocation2 + $0x440] sm:$0xff] }
  0x57   :  { %v160_v16 = vld [vmem:[#allocation2 + $0x448] sm:$0xff]  ;;  %496 = vst [vmem:[#allocation5 + $0x408] sm:$0xff] %v324_v5  ;;  %497 = vst [vmem:[#allocation5 + $0x410] sm:$0xff] %v325_v6  ;;  %v330_v17 = vmax.f32 %v158_v14, 0.0  ;;  %v331_v18 = vmax.f32 %v159_v15, 0.0  ;;  %v161_v20 = vld [vmem:[#allocation2 + $0x450] sm:$0xff] }
  0x58   :  { %498 = vst [vmem:[#allocation5 + $0x418] sm:$0xff] %v326_v7  ;;  %v332_v19 = vmax.f32 %v160_v16, 0.0  ;;  %v162_v21 = vld [vmem:[#allocation2 + $0x458] sm:$0xff]  ;;  %v163_v22 = vld [vmem:[#allocation2 + $0x460] sm:$0xff]  ;;  %499 = vst [vmem:[#allocation5 + $0x420] sm:$0xff] %v327_v11  ;;  %v333_v23 = vmax.f32 %v161_v20, 0.0 }
  0x59   :  { %500 = vst [vmem:[#allocation5 + $0x428] sm:$0xff] %v328_v12  ;;  %501 = vst [vmem:[#allocation5 + $0x430] sm:$0xff] %v329_v13  ;;  %v334_v24 = vmax.f32 %v162_v21, 0.0  ;;  %v335_v25 = vmax.f32 %v163_v22, 0.0  ;;  %v164_v26 = vld [vmem:[#allocation2 + $0x468] sm:$0xff]  ;;  %v165_v27 = vld [vmem:[#allocation2 + $0x470] sm:$0xff] }
  0x5a   :  { %v166_v28 = vld [vmem:[#allocation2 + $0x478] sm:$0xff]  ;;  %502 = vst [vmem:[#allocation5 + $0x438] sm:$0xff] %v330_v17  ;;  %503 = vst [vmem:[#allocation5 + $0x440] sm:$0xff] %v331_v18  ;;  %v336_v29 = vmax.f32 %v164_v26, 0.0  ;;  %v337_v30 = vmax.f32 %v165_v27, 0.0  ;;  %v167_v32 = vld [vmem:[#allocation2 + $0x480] sm:$0xff] }
  0x5b   :  { %504 = vst [vmem:[#allocation5 + $0x448] sm:$0xff] %v332_v19  ;;  %v338_v31 = vmax.f32 %v166_v28, 0.0  ;;  %v168_v33 = vld [vmem:[#allocation2 + $0x488] sm:$0xff]  ;;  %v169_v34 = vld [vmem:[#allocation2 + $0x490] sm:$0xff]  ;;  %505 = vst [vmem:[#allocation5 + $0x450] sm:$0xff] %v333_v23  ;;  %v339_v35 = vmax.f32 %v167_v32, 0.0 }
  0x5c   :  { %506 = vst [vmem:[#allocation5 + $0x458] sm:$0xff] %v334_v24  ;;  %507 = vst [vmem:[#allocation5 + $0x460] sm:$0xff] %v335_v25  ;;  %v340_v36 = vmax.f32 %v168_v33, 0.0  ;;  %v341_v37 = vmax.f32 %v169_v34, 0.0  ;;  %v170_v38 = vld [vmem:[#allocation2 + $0x498] sm:$0xff]  ;;  %v171_v39 = vld [vmem:[#allocation2 + $0x4a0] sm:$0xff] }
  0x5d   :  { %v172_v40 = vld [vmem:[#allocation2 + $0x4a8] sm:$0xff]  ;;  %508 = vst [vmem:[#allocation5 + $0x468] sm:$0xff] %v336_v29  ;;  %509 = vst [vmem:[#allocation5 + $0x470] sm:$0xff] %v337_v30  ;;  %v342_v41 = vmax.f32 %v170_v38, 0.0  ;;  %v343_v42 = vmax.f32 %v171_v39, 0.0  ;;  %v173_v44 = vld [vmem:[#allocation2 + $0x4b0] sm:$0xff] }
  0x5e   :  { %510 = vst [vmem:[#allocation5 + $0x478] sm:$0xff] %v338_v31  ;;  %v344_v43 = vmax.f32 %v172_v40, 0.0  ;;  %v174_v45 = vld [vmem:[#allocation2 + $0x4b8] sm:$0xff]  ;;  %v175_v46 = vld [vmem:[#allocation2 + $0x4c0] sm:$0xff]  ;;  %511 = vst [vmem:[#allocation5 + $0x480] sm:$0xff] %v339_v35  ;;  %v345_v47 = vmax.f32 %v173_v44, 0.0 }
  0x5f   :  { %512 = vst [vmem:[#allocation5 + $0x488] sm:$0xff] %v340_v36  ;;  %513 = vst [vmem:[#allocation5 + $0x490] sm:$0xff] %v341_v37  ;;  %v346_v48 = vmax.f32 %v174_v45, 0.0  ;;  %v347_v49 = vmax.f32 %v175_v46, 0.0  ;;  %v176_v50 = vld [vmem:[#allocation2 + $0x4c8] sm:$0xff]  ;;  %v177_v51 = vld [vmem:[#allocation2 + $0x4d0] sm:$0xff] }
  0x60   :  { %v178_v52 = vld [vmem:[#allocation2 + $0x4d8] sm:$0xff]  ;;  %514 = vst [vmem:[#allocation5 + $0x498] sm:$0xff] %v342_v41  ;;  %515 = vst [vmem:[#allocation5 + $0x4a0] sm:$0xff] %v343_v42  ;;  %v348_v53 = vmax.f32 %v176_v50, 0.0  ;;  %v349_v54 = vmax.f32 %v177_v51, 0.0  ;;  %v179_v56 = vld [vmem:[#allocation2 + $0x4e0] sm:$0xff] }
  0x61   :  { %516 = vst [vmem:[#allocation5 + $0x4a8] sm:$0xff] %v344_v43  ;;  %v350_v55 = vmax.f32 %v178_v52, 0.0  ;;  %v180_v57 = vld [vmem:[#allocation2 + $0x4e8] sm:$0xff]  ;;  %v181_v58 = vld [vmem:[#allocation2 + $0x4f0] sm:$0xff]  ;;  %517 = vst [vmem:[#allocation5 + $0x4b0] sm:$0xff] %v345_v47  ;;  %v351_v59 = vmax.f32 %v179_v56, 0.0 }
  0x62   :  { %518 = vst [vmem:[#allocation5 + $0x4b8] sm:$0xff] %v346_v48  ;;  %519 = vst [vmem:[#allocation5 + $0x4c0] sm:$0xff] %v347_v49  ;;  %v352_v60 = vmax.f32 %v180_v57, 0.0  ;;  %v353_v61 = vmax.f32 %v181_v58, 0.0  ;;  %v182_v62 = vld [vmem:[#allocation2 + $0x4f8] sm:$0xff]  ;;  %v183_v63 = vld [vmem:[#allocation2 + $0x500] sm:$0xff] }
  0x63   :  { %v184_v0 = vld [vmem:[#allocation2 + $0x508] sm:$0xff]  ;;  %520 = vst [vmem:[#allocation5 + $0x4c8] sm:$0xff] %v348_v53  ;;  %521 = vst [vmem:[#allocation5 + $0x4d0] sm:$0xff] %v349_v54  ;;  %v354_v1 = vmax.f32 %v182_v62, 0.0  ;;  %v355_v2 = vmax.f32 %v183_v63, 0.0  ;;  %v185_v4 = vld [vmem:[#allocation2 + $0x510] sm:$0xff] }
  0x64   :  { %522 = vst [vmem:[#allocation5 + $0x4d8] sm:$0xff] %v350_v55  ;;  %v356_v3 = vmax.f32 %v184_v0, 0.0  ;;  %v186_v5 = vld [vmem:[#allocation2 + $0x518] sm:$0xff]  ;;  %v187_v6 = vld [vmem:[#allocation2 + $0x520] sm:$0xff]  ;;  %523 = vst [vmem:[#allocation5 + $0x4e0] sm:$0xff] %v351_v59  ;;  %v357_v7 = vmax.f32 %v185_v4, 0.0 }
  0x65   :  { %524 = vst [vmem:[#allocation5 + $0x4e8] sm:$0xff] %v352_v60  ;;  %525 = vst [vmem:[#allocation5 + $0x4f0] sm:$0xff] %v353_v61  ;;  %v358_v8 = vmax.f32 %v186_v5, 0.0  ;;  %v359_v9 = vmax.f32 %v187_v6, 0.0  ;;  %v188_v10 = vld [vmem:[#allocation2 + $0x528] sm:$0xff]  ;;  %v189_v11 = vld [vmem:[#allocation2 + $0x530] sm:$0xff] }
  0x66   :  { %v190_v12 = vld [vmem:[#allocation2 + $0x538] sm:$0xff]  ;;  %526 = vst [vmem:[#allocation5 + $0x4f8] sm:$0xff] %v354_v1  ;;  %527 = vst [vmem:[#allocation5 + $0x500] sm:$0xff] %v355_v2  ;;  %v360_v13 = vmax.f32 %v188_v10, 0.0  ;;  %v361_v14 = vmax.f32 %v189_v11, 0.0 }
  0x67   :  { %528 = vst [vmem:[#allocation5 + $0x508] sm:$0xff] %v356_v3  ;;  %v362_v15 = vmax.f32 %v190_v12, 0.0  ;;  %v191_v16 = vld [vmem:[#allocation2 + $0x540] sm:$0x7f]  ;;  %529 = vst [vmem:[#allocation5 + $0x510] sm:$0xff] %v357_v7 }
  0x68   :  { %530 = vst [vmem:[#allocation5 + $0x518] sm:$0xff] %v358_v8  ;;  %531 = vst [vmem:[#allocation5 + $0x520] sm:$0xff] %v359_v9  ;;  %v363_v17 = vmax.f32 %v191_v16, 0.0  ;;  %v192_v18 = vld [vmem:[#allocation2 + $0x548] sm:$0x7f] }
  0x69   :  { %v193_v19 = vld [vmem:[#allocation2 + $0x550] sm:$0x7f]  ;;  %532 = vst [vmem:[#allocation5 + $0x528] sm:$0xff] %v360_v13  ;;  %533 = vst [vmem:[#allocation5 + $0x530] sm:$0xff] %v361_v14  ;;  %v364_v20 = vmax.f32 %v192_v18, 0.0 }
  0x6a   :  { %534 = vst [vmem:[#allocation5 + $0x538] sm:$0xff] %v362_v15  ;;  %v365_v21 = vmax.f32 %v193_v19, 0.0  ;;  %v194_v22 = vld [vmem:[#allocation2 + $0x558] sm:$0x7f]  ;;  %535 = vst [vmem:[#allocation5 + $0x540] sm:$0x7f] %v363_v17 }
  0x6b   :  { %v366_v23 = vmax.f32 %v194_v22, 0.0  ;;  %536 = vst [vmem:[#allocation5 + $0x548] sm:$0x7f] %v364_v20 }
  0x6c   :  { %537 = vst [vmem:[#allocation5 + $0x550] sm:$0x7f] %v365_v21 }
  0x6d   :  { %538 = vst [vmem:[#allocation5 + $0x558] sm:$0x7f] %v366_v23 }
  0x6e   :  { %593 = shalt.err (!%p590_p12)
}
  0x6f   :  { %s594_s24 = scalar_lea.hbm %s653_s1, 22016 }
  0x70   :  { %p595_p13 = scmp.ne.s32.totalorder %s653_s1, %s594_s24  ;;  %p598_p0 = scmp.lt.u32.totalorder %s594_s24, %s653_s1 }
  0x72   :  { %p600_p1 = pnand %p598_p0, %p595_p13 }
  0x74   :  { %603 = shalt.err (!%p600_p1)
}
  0x75   :  { %550 = dma.vmem_to_hbm [thread:$0]  %s545_s20, 22016, %s653_s1, [#allocation4], %s609_s16, %s609_s16, %s610_s17  }
  0x76   :  { %606 = dma.done.wait [#allocation4], 22016  }
  0x77   :  { %607 = vsyncadd [#allocation4], 4294945280 }
  0x78   :  { %554 = vsyncpa [#allocation3], 1 }
  0x79   :  { %555 = vsyncpa [#allocation4], 1 }

</bundles_post_ra>
